<compile_context>
chip_gen: v7x
topology: tpu7x:2x2x1
jax: 0.10.0
libtpu: 0.0.40
codegen_flags: <defaults>
</compile_context>

<pallas_src>
import functools
import math

import jax
import jax.numpy as jnp
from jax.experimental import pallas as pl
from jax.experimental.pallas import tpu as pltpu


def _round_up(x, m):
    return -(-x // m) * m


def _pick_tile(extent, target, align):
    """Largest multiple of `align` that divides `extent` and is <= target."""
    target = max(target, align)
    best = align
    t = align
    while t <= min(target, extent):
        if extent % t == 0:
            best = t
        t += align
    return best


def _be_linear_kernel(*refs, mxu_dtype, has_r, has_acc, sb_resident):
    # Ref order: X, [R], W, S, bias, out, [acc]
    refs = list(refs)
    x_ref = refs.pop(0)
    r_ref = refs.pop(0) if has_r else None
    w_ref = refs.pop(0)
    s_ref = refs.pop(0)
    b_ref = refs.pop(0)
    o_ref = refs.pop(0)
    acc_ref = refs.pop(0) if has_acc else o_ref   # f32 out: accumulate in-place

    j = pl.program_id(1)
    k = pl.program_id(2)

    @pl.when(k == 0)
    def _init():
        acc_ref[...] = jnp.zeros_like(acc_ref)

    # Elementwise scaling in f32 on the VPU; only MXU operands are (maybe) bf16.
    x = x_ref[...]
    if has_r:
        x = x * r_ref[k]                 # resident R period, k-th (tm, tk) chunk

    acc_ref[...] += jnp.dot(x.astype(mxu_dtype), w_ref[...],
                            preferred_element_type=jnp.float32)

    @pl.when(k == pl.num_programs(2) - 1)
    def _finalize():
        s = s_ref[j] if sb_resident else s_ref[...]
        b = b_ref[j] if sb_resident else b_ref[...]
        o_ref[...] = (acc_ref[...] * s + b).astype(o_ref.dtype)


def batch_ensemble_linear(X, W, r, s, bias, *, use_bf16_matmul=True,
                          tm_target=512, tn_target=512, tk_target=512):
    """Pallas implementation of BatchEnsembleLinear.forward.

    X:    (B*M, C_in)   rows ordered (x0,m0), (x0,m1), ..., (x1,m0), ...
    W:    (C_out, C_in)
    r:    (M, C_in)
    s:    (M, C_out)
    bias: (M, C_out)
    returns (B*M, C_out)
    """
    N, c_in = X.shape
    c_out, c_in_w = W.shape
    M = r.shape[0]
    assert c_in_w == c_in, "W and X in_features mismatch"
    assert N % M == 0, "rows of X must be a multiple of num_models"
    assert s.shape == (M, c_out) and bias.shape == (M, c_out)
    # TODO(synk): bias=None variant of the module is not implemented (the
    # reference forward requires bias anyway).

    x_dtype = jnp.dtype(X.dtype)
    out_dtype = x_dtype
    itemsize = x_dtype.itemsize
    w_dtype = jnp.bfloat16 if use_bf16_matmul else x_dtype
    w_isz = jnp.dtype(w_dtype).itemsize
    mxu_dtype = jnp.bfloat16 if use_bf16_matmul else x_dtype

    # ---- tiling ----------------------------------------------------------
    # Row tile must be a multiple of M (one tile = whole model periods) and of
    # the sublane packing for X's dtype; column tiles are multiples of 128.
    sub = 8 * (4 // itemsize) if itemsize in (1, 2, 4) else 8
    row_align = (M * sub) // math.gcd(M, sub)               # lcm(M, sublane)
    n_pad = _round_up(N, row_align)
    cin_pad = _round_up(c_in, 128)
    cout_pad = _round_up(c_out, 128)

    tm = _pick_tile(n_pad, tm_target, row_align)
    tn = _pick_tile(cout_pad, tn_target, 128)
    tk = _pick_tile(cin_pad, tk_target, 128)

    # v7x has 2 TensorCores: make sure the parallel (i, j) grid has >= 2 tiles
    # when the problem allows it (costs ~nothing on v5e/v6e).
    if (n_pad // tm) * (cout_pad // tn) < 2:
        if cout_pad // 128 >= 2:
            tn = _pick_tile(cout_pad, cout_pad // 2, 128)
        elif n_pad // row_align >= 2:
            tm = _pick_tile(n_pad, n_pad // 2, row_align)

    assert tm % M == 0 and n_pad % tm == 0
    gi, gj, gk = n_pad // tm, cout_pad // tn, cin_pad // tk

    # ---- operand prep (one-time wrapper work, amortized over re-reads) ----
    def pad2(a, rows, cols):
        pr, pc = rows - a.shape[0], cols - a.shape[1]
        return a if (pr == 0 and pc == 0) else jnp.pad(a, ((0, pr), (0, pc)))

    X_p = pad2(X, n_pad, cin_pad)
    # Native (C_out, C_in) -> (C_in, C_out) + cast ONCE, so the kernel dot
    # needs no per-tile transpose (XLU) and no per-tile cast (VPU).
    Wt = pad2(W, cout_pad, cin_pad).T.astype(w_dtype)        # (cin_pad, cout_pad)

    reps = tm // M
    r_period = jnp.tile(pad2(r, M, cin_pad), (reps, 1))      # (tm, cin_pad)
    s_period = jnp.tile(pad2(s, M, cout_pad), (reps, 1))     # (tm, cout_pad)
    b_period = jnp.tile(pad2(bias, M, cout_pad), (reps, 1))  # (tm, cout_pad)

    # Residency decisions (single-copy bytes; pipeline still reserves 2 bufs).
    RESIDENT_BUDGET = 8 << 20
    r_resident = tm * cin_pad * itemsize <= RESIDENT_BUDGET
    sb_resident = 2 * tm * cout_pad * itemsize <= RESIDENT_BUDGET

    if r_resident:
        # Pre-block the single tm-row period into (gk, tm, tk); constant
        # index_map -> DMA'd into VMEM exactly once for the whole grid.
        R_in = r_period.reshape(tm, gk, tk).transpose(1, 0, 2)
        r_inputs = [R_in]
        r_specs = [pl.BlockSpec((gk, tm, tk), lambda i, j, k: (0, 0, 0))]
    else:
        # Very large C_in: fuse X*R once in the wrapper instead.
        R_full = jnp.tile(pad2(r, M, cin_pad), (n_pad // M, 1))
        X_p = X_p * R_full
        r_inputs, r_specs = [], []

    if sb_resident:
        S_in = s_period.reshape(tm, gj, tn).transpose(1, 0, 2)   # (gj, tm, tn)
        B_in = b_period.reshape(tm, gj, tn).transpose(1, 0, 2)
        s_spec = pl.BlockSpec((gj, tm, tn), lambda i, j, k: (0, 0, 0))
        b_spec = pl.BlockSpec((gj, tm, tn), lambda i, j, k: (0, 0, 0))
    else:
        S_in, B_in = s_period, b_period
        s_spec = pl.BlockSpec((tm, tn), lambda i, j, k: (0, j))
        b_spec = pl.BlockSpec((tm, tn), lambda i, j, k: (0, j))

    # f32 outputs accumulate directly into the resident output block; keep a
    # separate f32 scratch only for lower-precision outputs.
    has_acc = out_dtype != jnp.float32
    scratch_shapes = [pltpu.VMEM((tm, tn), jnp.float32)] if has_acc else []

    # ---- VMEM budget & cost estimate --------------------------------------
    # NOTE: resident blocks could be single-buffered via pl.Buffered(1); left
    # at the default double-buffering for portability (indices never change,
    # so no extra DMA is issued either way).
    vmem_need = (2 * tm * tk * itemsize                      # X (double-buffered)
                 + 2 * tk * tn * w_isz                       # W
                 + 2 * tm * tn * itemsize                    # output
                 + (tm * tn * 4 if has_acc else 0)           # accumulator
                 + (2 * tm * cin_pad * itemsize if r_resident else 0)
                 + (2 * 2 * tm * cout_pad * itemsize if sb_resident
                    else 2 * 2 * tm * tn * itemsize))
    vmem_limit = int(min(100 << 20, max(32 << 20, int(vmem_need * 1.25) + (4 << 20))))

    cost = pl.CostEstimate(
        flops=2 * n_pad * cin_pad * cout_pad,
        transcendentals=0,
        bytes_accessed=(gj * n_pad * cin_pad * itemsize          # X re-read per j
                        + gi * cin_pad * cout_pad * w_isz        # W re-read per i
                        + (tm * cin_pad * itemsize if r_resident
                           else n_pad * cin_pad * itemsize)      # R once / fused pass
                        + (2 * tm * cout_pad * itemsize if sb_resident
                           else 2 * gi * tm * cout_pad * itemsize)
                        + n_pad * cout_pad * itemsize))          # output write

    kernel = functools.partial(_be_linear_kernel, mxu_dtype=mxu_dtype,
                               has_r=r_resident, has_acc=has_acc,
                               sb_resident=sb_resident)

    out = pl.pallas_call(
        kernel,
        out_shape=jax.ShapeDtypeStruct((n_pad, cout_pad), out_dtype),
        grid_spec=pltpu.PrefetchScalarGridSpec(
            num_scalar_prefetch=0,
            grid=(gi, gj, gk),
            in_specs=[pl.BlockSpec((tm, tk), lambda i, j, k: (i, k))]    # X
                     + r_specs                                           # R (resident)
                     + [pl.BlockSpec((tk, tn), lambda i, j, k: (k, j)),  # W.T
                        s_spec,                                          # S period
                        b_spec],                                         # bias period
            out_specs=pl.BlockSpec((tm, tn), lambda i, j, k: (i, j)),
            scratch_shapes=scratch_shapes,
        ),
        compiler_params=pltpu.CompilerParams(
            dimension_semantics=("parallel", "parallel", "arbitrary"),
            vmem_limit_bytes=vmem_limit),
        cost_estimate=cost,
    )(X_p, *r_inputs, Wt, S_in, B_in)

    return out[:N, :c_out]


def init_params(key, in_features, out_features, num_models):
    """Deterministic init mirroring BatchEnsembleLinear.reset_parameters."""
    kW, kb, kr, ks = jax.random.split(key, 4)
    bound = 1.0 / math.sqrt(in_features)   # kaiming_uniform_(a=sqrt(5)) equivalent
    W = jax.random.uniform(kW, (out_features, in_features),
                           minval=-bound, maxval=bound, dtype=jnp.float32)
    bias = jax.random.uniform(kb, (num_models, out_features),
                              minval=-bound, maxval=bound, dtype=jnp.float32)
    r = (jax.random.bernoulli(kr, 0.5, (num_models, in_features))
         .astype(jnp.float32) * 2.0 - 1.0)
    s = (jax.random.bernoulli(ks, 0.5, (num_models, out_features))
         .astype(jnp.float32) * 2.0 - 1.0)
    return W, r, s, bias


def _reference(X, W, r, s, bias, M):
    B = X.shape[0] // M
    R = jnp.tile(r, (B, 1))
    S = jnp.tile(s, (B, 1))
    Bb = jnp.tile(bias, (B, 1))
    return (X * R) @ W.T * S + Bb


if __name__ == "__main__":
    key = jax.random.PRNGKey(0)

    # --- test 1: small shapes, single-tile grid ---------------------------
    in_f, out_f, M, batch = 32, 64, 4, 2
    kp, kx, key = jax.random.split(key, 3)
    W, r, s, bias = init_params(kp, in_f, out_f, M)
    X = jax.random.normal(kx, (batch * M, in_f), dtype=jnp.float32)
    ref = _reference(X, W, r, s, bias, M)

    out_f32 = jax.block_until_ready(
        batch_ensemble_linear(X, W, r, s, bias, use_bf16_matmul=False))
    assert out_f32.shape == (batch * M, out_f)
    assert jnp.allclose(out_f32, ref, atol=1e-4, rtol=1e-4), "t1 f32 mismatch"

    out_bf16 = jax.block_until_ready(
        batch_ensemble_linear(X, W, r, s, bias, use_bf16_matmul=True))
    assert jnp.allclose(out_bf16, ref, atol=1e-1, rtol=1e-1), "t1 bf16 mismatch"

    # --- test 2: multi-tile grid (gi=gj=gk=2) exercising the K reduction,
    # resident R[k] / S[j] / bias[j] indexing, and in-place f32 accumulation.
    in_f2, out_f2, M2, batch2 = 256, 256, 4, 8
    kp2, kx2 = jax.random.split(key)
    W2, r2, s2, bias2 = init_params(kp2, in_f2, out_f2, M2)
    X2 = jax.random.normal(kx2, (batch2 * M2, in_f2), dtype=jnp.float32)
    ref2 = _reference(X2, W2, r2, s2, bias2, M2)

    out2_f32 = jax.block_until_ready(
        batch_ensemble_linear(X2, W2, r2, s2, bias2, use_bf16_matmul=False,
                              tm_target=16, tn_target=128, tk_target=128))
    assert out2_f32.shape == (batch2 * M2, out_f2)
    assert jnp.allclose(out2_f32, ref2, atol=1e-4, rtol=1e-4), "t2 f32 mismatch"

    out2_bf16 = jax.block_until_ready(
        batch_ensemble_linear(X2, W2, r2, s2, bias2, use_bf16_matmul=True,
                              tm_target=16, tn_target=128, tk_target=128))
    assert jnp.allclose(out2_bf16, ref2, atol=2e-1, rtol=2e-1), "t2 bf16 mismatch"

    print("KERNEL_OK")
</pallas_src>

<mosaic_0001>
module attributes {stable_mosaic.version = 11 : i64} {
  func.func @_be_linear_kernel(%arg0: i32, %arg1: i32, %arg2: i32, %arg3: memref<8x128xf32, #tpu.memory_space<vmem>>, %arg4: memref<1x8x128xf32, #tpu.memory_space<vmem>>, %arg5: memref<128x128xf32, #tpu.memory_space<vmem>>, %arg6: memref<1x8x128xf32, #tpu.memory_space<vmem>>, %arg7: memref<1x8x128xf32, #tpu.memory_space<vmem>>, %arg8: memref<8x128xf32, #tpu.memory_space<vmem>>) attributes {dimension_semantics = [#tpu.dimension_semantics<parallel>, #tpu.dimension_semantics<parallel>, #tpu.dimension_semantics<arbitrary>], iteration_bounds = array<i64: 1, 1, 1>, scalar_prefetch = 0 : i64, scratch_operands = 0 : i64, tpu.core_type = #tpu.core_type<tc>, window_params = [{transform_indices = @transform_0, window_bounds = array<i64: 8, 128>}, {pipeline_mode = #tpu.pipeline_mode<synchronous>, transform_indices = @transform_1, window_bounds = array<i64: 1, 8, 128>}, {transform_indices = @transform_2, window_bounds = array<i64: 128, 128>}, {pipeline_mode = #tpu.pipeline_mode<synchronous>, transform_indices = @transform_3, window_bounds = array<i64: 1, 8, 128>}, {pipeline_mode = #tpu.pipeline_mode<synchronous>, transform_indices = @transform_4, window_bounds = array<i64: 1, 8, 128>}, {transform_indices = @transform_5, window_bounds = array<i64: 8, 128>}]} {
    %c0_i32 = arith.constant 0 : i32
    %0 = arith.cmpi eq, %arg2, %c0_i32 : i32
    %1 = arith.extui %0 : i1 to i32
    %c0_i32_0 = arith.constant 0 : i32
    %2 = arith.cmpi ne, %1, %c0_i32_0 : i32
    scf.if %2 {
      %cst_12 = arith.constant 0.000000e+00 : f32
      %16 = vector.broadcast %cst_12 : f32 to vector<8x128xf32>
      %c0_13 = arith.constant 0 : index
      %c0_14 = arith.constant 0 : index
      %17 = vector.load %arg8[%c0_13, %c0_14] : memref<8x128xf32, #tpu.memory_space<vmem>>, vector<8x128xf32>
      tpu.vector_store %arg8[%c0_13, %c0_14], %16 {strides = array<i32>} : memref<8x128xf32, #tpu.memory_space<vmem>>, vector<8x128xf32>,
    } else {
    }
    %c0 = arith.constant 0 : index
    %c0_1 = arith.constant 0 : index
    %3 = vector.load %arg3[%c0, %c0_1] : memref<8x128xf32, #tpu.memory_space<vmem>>, vector<8x128xf32>
    %4 = arith.index_cast %arg2 : i32 to index
    %c0_2 = arith.constant 0 : index
    %c0_3 = arith.constant 0 : index
    %5 = vector.load %arg4[%4, %c0_2, %c0_3] : memref<1x8x128xf32, #tpu.memory_space<vmem>>, vector<1x8x128xf32>
    %6 = vector.shape_cast %5 : vector<1x8x128xf32> to vector<8x128xf32>
    %7 = arith.mulf %3, %6 : vector<8x128xf32>
    %c0_4 = arith.constant 0 : index
    %c0_5 = arith.constant 0 : index
    %8 = vector.load %arg8[%c0_4, %c0_5] : memref<8x128xf32, #tpu.memory_space<vmem>>, vector<8x128xf32>
    %c0_6 = arith.constant 0 : index
    %c0_7 = arith.constant 0 : index
    %9 = vector.load %arg5[%c0_6, %c0_7] : memref<128x128xf32, #tpu.memory_space<vmem>>, vector<128x128xf32>
    %cst = arith.constant dense<0.000000e+00> : vector<8x128xf32>
    %10 = tpu.matmul %7, %9, %cst {dimension_numbers = #tpu.dot_dimension_numbers<[1], [0], [0], [1], [0, 0, 1, 1], [], []>} : vector<8x128xf32>, vector<128x128xf32>, vector<8x128xf32> -> vector<8x128xf32>
    %11 = arith.addf %8, %10 : vector<8x128xf32>
    %c0_8 = arith.constant 0 : index
    %c0_9 = arith.constant 0 : index
    %12 = vector.load %arg8[%c0_8, %c0_9] : memref<8x128xf32, #tpu.memory_space<vmem>>, vector<8x128xf32>
    tpu.vector_store %arg8[%c0_8, %c0_9], %11 {strides = array<i32>} : memref<8x128xf32, #tpu.memory_space<vmem>>, vector<8x128xf32>,
    %c0_i32_10 = arith.constant 0 : i32
    %13 = arith.cmpi eq, %arg2, %c0_i32_10 : i32
    %14 = arith.extui %13 : i1 to i32
    %c0_i32_11 = arith.constant 0 : i32
    %15 = arith.cmpi ne, %14, %c0_i32_11 : i32
    scf.if %15 {
      %16 = arith.index_cast %arg1 : i32 to index
      %c0_12 = arith.constant 0 : index
      %c0_13 = arith.constant 0 : index
      %17 = vector.load %arg6[%16, %c0_12, %c0_13] : memref<1x8x128xf32, #tpu.memory_space<vmem>>, vector<1x8x128xf32>
      %18 = vector.shape_cast %17 : vector<1x8x128xf32> to vector<8x128xf32>
      %19 = arith.index_cast %arg1 : i32 to index
      %c0_14 = arith.constant 0 : index
      %c0_15 = arith.constant 0 : index
      %20 = vector.load %arg7[%19, %c0_14, %c0_15] : memref<1x8x128xf32, #tpu.memory_space<vmem>>, vector<1x8x128xf32>
      %21 = vector.shape_cast %20 : vector<1x8x128xf32> to vector<8x128xf32>
      %c0_16 = arith.constant 0 : index
      %c0_17 = arith.constant 0 : index
      %22 = vector.load %arg8[%c0_16, %c0_17] : memref<8x128xf32, #tpu.memory_space<vmem>>, vector<8x128xf32>
      %23 = arith.mulf %22, %18 : vector<8x128xf32>
      %24 = arith.addf %23, %21 : vector<8x128xf32>
      %c0_18 = arith.constant 0 : index
      %c0_19 = arith.constant 0 : index
      %25 = vector.load %arg8[%c0_18, %c0_19] : memref<8x128xf32, #tpu.memory_space<vmem>>, vector<8x128xf32>
      tpu.vector_store %arg8[%c0_18, %c0_19], %24 {strides = array<i32>} : memref<8x128xf32, #tpu.memory_space<vmem>>, vector<8x128xf32>,
    } else {
    }
    return
  }
  func.func @transform_0(%arg0: i32, %arg1: i32, %arg2: i32) -> (i32, i32) {
    %c0_i32 = arith.constant 0 : i32
    return %arg0, %arg2 : i32, i32
  }
  func.func @transform_1(%arg0: i32, %arg1: i32, %arg2: i32) -> (i32, i32, i32) {
    %c0_i32 = arith.constant 0 : i32
    %c0_i32_0 = arith.constant 0 : i32
    %c0_i32_1 = arith.constant 0 : i32
    %c0_i32_2 = arith.constant 0 : i32
    return %c0_i32, %c0_i32_0, %c0_i32_1 : i32, i32, i32
  }
  func.func @transform_2(%arg0: i32, %arg1: i32, %arg2: i32) -> (i32, i32) {
    %c0_i32 = arith.constant 0 : i32
    return %arg2, %arg1 : i32, i32
  }
  func.func @transform_3(%arg0: i32, %arg1: i32, %arg2: i32) -> (i32, i32, i32) {
    %c0_i32 = arith.constant 0 : i32
    %c0_i32_0 = arith.constant 0 : i32
    %c0_i32_1 = arith.constant 0 : i32
    %c0_i32_2 = arith.constant 0 : i32
    return %c0_i32, %c0_i32_0, %c0_i32_1 : i32, i32, i32
  }
  func.func @transform_4(%arg0: i32, %arg1: i32, %arg2: i32) -> (i32, i32, i32) {
    %c0_i32 = arith.constant 0 : i32
    %c0_i32_0 = arith.constant 0 : i32
    %c0_i32_1 = arith.constant 0 : i32
    %c0_i32_2 = arith.constant 0 : i32
    return %c0_i32, %c0_i32_0, %c0_i32_1 : i32, i32, i32
  }
  func.func @transform_5(%arg0: i32, %arg1: i32, %arg2: i32) -> (i32, i32) {
    %c0_i32 = arith.constant 0 : i32
    return %arg0, %arg1 : i32, i32
  }
}

</mosaic_0001>

<bundles_post_ra>
// kernel: tpu_custom_call.1
= control target key start
LH: loop header
LB: loop body
LE: loop exit
PB: predicated region body
PF: predicated region fallthrough
CT: control target
= control target key end

     0   :  { %10 = vsyncpa [#allocation3], 0  ;;  %s505_s0 = inlined_call_operand.hbm [shape: f32[8,128], index: 0, kind: input, shape index: {}]   ;;  %s506_s1 = inlined_call_operand.hbm [shape: f32[1,8,128], index: 1, kind: input, shape index: {}]   ;;  %s507_s2 = inlined_call_operand.hbm [shape: f32[128,128], index: 2, kind: input, shape index: {}]   ;;  %s508_s3 = inlined_call_operand.vmem [shape: f32[1,8,128], index: 3, kind: input, shape index: {}]   ;;  %s509_s4 = inlined_call_operand.hbm [shape: f32[1,8,128], index: 4, kind: input, shape index: {}]   ;;  %s510_s5 = inlined_call_operand.hbm [shape: f32[8,128], index: 5, kind: output, shape index: {}]  }
   0x1   :  { %11 = vsyncpa [#allocation6], 0 }
   0x2   :  { %12 = vsyncpa [#allocation9], 0 }
   0x3   :  { %13 = vsyncpa [#allocation4], 0  ;;  %s402_s18 = smov [#allocation5]   ;;  %s403_s20 = smov [#allocation2]  }
   0x4   :  { %s30_s19 = sshll.u32 %s402_s18, 4  ;;  %s20_s21 = sshll.u32 %s403_s20, 4  ;;  %s31_s19 = int_to_ptr.vmem [resolvable:$true] %s30_s19  ;;  %s21_s21 = int_to_ptr.vmem [resolvable:$true] %s20_s21 }
   0x5   :  { %s284_s24 = scalar_lea.hbm %s506_s1, 128 }
   0x6   :  { %p285_p0 = scmp.ne.s32.totalorder %s506_s1, %s284_s24  ;;  %p288_p1 = scmp.lt.u32.totalorder %s284_s24, %s506_s1 }
   0x8   :  { %p290_p2 = pnand %p288_p1, %p285_p0 }
   0xa   :  { %293 = shalt.err (!%p290_p2)
}
   0xb   :  { %s294_s29 = scalar_lea.vmem %s31_s19, 128  ;;  %p299_p4 = scmp.lt.s32.totalorder %s31_s19, %s31_s19 }
   0xc   :  { %p295_p3 = scmp.ne.s32.totalorder %s31_s19, %s294_s29  ;;  %p300_p5 = scmp.lt.s32.totalorder %s294_s29, %s294_s29 }
   0xe   :  { %p301_p6 = por %p300_p5, %p299_p4 }
  0x10   :  { %p302_p7 = pnand %p301_p6, %p295_p3 }
  0x12   :  { %305 = shalt.err (!%p302_p7)
}
  0x13   :  { %33 = dma.hbm_to_vmem [thread:$0]  %s506_s1, 128, %s31_s19, [#allocation6]  }
  0x14   :  { %s306_s9 = scalar_lea.hbm %s505_s0, 128 }
  0x15   :  { %p307_p8 = scmp.ne.s32.totalorder %s505_s0, %s306_s9  ;;  %p310_p9 = scmp.lt.u32.totalorder %s306_s9, %s505_s0 }
  0x17   :  { %p312_p10 = pnand %p310_p9, %p307_p8 }
  0x19   :  { %315 = shalt.err (!%p312_p10)
}
  0x1a   :  { %s316_s14 = scalar_lea.vmem %s21_s21, 128  ;;  %p321_p12 = scmp.lt.s32.totalorder %s21_s21, %s21_s21 }
  0x1b   :  { %p317_p11 = scmp.ne.s32.totalorder %s21_s21, %s316_s14  ;;  %p322_p13 = scmp.lt.s32.totalorder %s316_s14, %s316_s14 }
  0x1d   :  { %p323_p0 = por %p322_p13, %p321_p12 }
  0x1f   :  { %p324_p1 = pnand %p323_p0, %p317_p11 }
  0x21   :  { %327 = shalt.err (!%p324_p1)
}
  0x22   :  { %23 = dma.hbm_to_vmem [thread:$0]  %s505_s0, 128, %s21_s21, [#allocation3]  }
  0x23   :  { %s404_s16 = smov [#allocation7]   ;;  %s328_s20 = scalar_lea.hbm %s507_s2, 2048 }
  0x24   :  { %s39_s17 = sshll.u32 %s404_s16, 4  ;;  %p329_p2 = scmp.ne.s32.totalorder %s507_s2, %s328_s20  ;;  %s40_s17 = int_to_ptr.vmem [resolvable:$true] %s39_s17 }
  0x25   :  { %p332_p3 = scmp.lt.u32.totalorder %s328_s20, %s507_s2 }
  0x27   :  { %p334_p4 = pnand %p332_p3, %p329_p2 }
  0x29   :  { %337 = shalt.err (!%p334_p4)
}
  0x2a   :  { %s338_s26 = scalar_lea.vmem %s40_s17, 2048  ;;  %p343_p6 = scmp.lt.s32.totalorder %s40_s17, %s40_s17 }
  0x2b   :  { %p339_p5 = scmp.ne.s32.totalorder %s40_s17, %s338_s26  ;;  %p344_p7 = scmp.lt.s32.totalorder %s338_s26, %s338_s26 }
  0x2d   :  { %p345_p8 = por %p344_p7, %p343_p6 }
  0x2f   :  { %p346_p9 = pnand %p345_p8, %p339_p5 }
  0x31   :  { %349 = shalt.err (!%p346_p9)
}
  0x32   :  { %s405_s0 = smov 128   ;;  %s406_s21 = smov 8  }
  0x33   :  { %45 = dma.hbm_to_vmem [thread:$0]  %s507_s2, 2048, %s40_s17, [#allocation6], %s405_s0, %s405_s0, %s406_s21  }
  0x34   :  { %s407_s29 = smov [#allocation8]   ;;  %s350_s8 = scalar_lea.hbm %s509_s4, 128 }
  0x35   :  { %s54_s30 = sshll.u32 %s407_s29, 4  ;;  %p351_p10 = scmp.ne.s32.totalorder %s509_s4, %s350_s8  ;;  %s55_s30 = int_to_ptr.vmem [resolvable:$true] %s54_s30 }
  0x36   :  { %p354_p11 = scmp.lt.u32.totalorder %s350_s8, %s509_s4 }
  0x38   :  { %p356_p12 = pnand %p354_p11, %p351_p10 }
  0x3a   :  { %359 = shalt.err (!%p356_p12)
}
  0x3b   :  { %s360_s13 = scalar_lea.vmem %s55_s30, 128  ;;  %p365_p0 = scmp.lt.s32.totalorder %s55_s30, %s55_s30 }
  0x3c   :  { %p361_p13 = scmp.ne.s32.totalorder %s55_s30, %s360_s13  ;;  %p366_p1 = scmp.lt.s32.totalorder %s360_s13, %s360_s13 }
  0x3e   :  { %p367_p2 = por %p366_p1, %p365_p0 }
  0x40   :  { %p368_p3 = pnand %p367_p2, %p361_p13 }
  0x42   :  { %371 = shalt.err (!%p368_p3)
}
  0x43   :  { %57 = dma.hbm_to_vmem [thread:$0]  %s509_s4, 128, %s55_s30, [#allocation9]  }
  0x44   :  { %394 = dma.done.wait [#allocation3], 128  }
  0x45   :  { %395 = vsyncadd [#allocation3], 4294967168 }
  0x46   :  { %396 = dma.done.wait [#allocation6], 2176  }
  0x47   :  { %397 = vsyncadd [#allocation6], 4294965120 }
  0x48   :  { %398 = dma.done.wait [#allocation9], 128  }
  0x49   :  { %399 = vsyncadd [#allocation9], 4294967168  ;;  %v408_v0 = vmov 0.0|0.0   ;;  %vm409_vm0 = vmmov 0   ;;  %v410_v1 = vmov 0.0   ;;  %v81_v2 = vld [vmem:[#allocation7] sm:$0xff] }
  0x4a   :  { %250 = vmatprep.subr.bf16.mxu0 %v408_v0  ;;  %247 = vmatprep.mubr.msk.f32.mxu0 %vm409_vm0, %v410_v1  ;;  %v82_v3 = vld [vmem:[#allocation7 + $0x8] sm:$0xff]  ;;  %v83_v4 = vld [vmem:[#allocation7 + $0x10] sm:$0xff]  ;;  %v84_v6 = vld [vmem:[#allocation7 + $0x18] sm:$0xff]  ;;  %s411_s15 = smov [#allocation10]  }
  0x4b   :  { %v251_v5 = vpack.c.bf16 %v82_v3, %v81_v2  ;;  %v254_v7 = vpack.c.bf16 %v84_v6, %v83_v4  ;;  %v85_v8 = vld [vmem:[#allocation7 + $0x20] sm:$0xff]  ;;  %v86_v9 = vld [vmem:[#allocation7 + $0x28] sm:$0xff]  ;;  %v87_v11 = vld [vmem:[#allocation7 + $0x30] sm:$0xff]  ;;  %s187_s16 = sshll.u32 %s411_s15, 4  ;;  %s188_s16 = int_to_ptr.vmem [resolvable:$true] %s187_s16 }
  0x4c   :  { %v257_v10 = vpack.c.bf16 %v86_v9, %v85_v8  ;;  %v88_v12 = vld [vmem:[#allocation7 + $0x38] sm:$0xff]  ;;  %v89_v14 = vld [vmem:[#allocation7 + $0x40] sm:$0xff]  ;;  %v90_v15 = vld [vmem:[#allocation7 + $0x48] sm:$0xff]  ;;  %s372_s17 = scalar_lea.vmem %s188_s16, 128  ;;  %p377_p5 = scmp.lt.s32.totalorder %s188_s16, %s188_s16 }
  0x4d   :  { %252 = vmatpush3.bf16.msra.mxu0 %v251_v5  ;;  %v260_v13 = vpack.c.bf16 %v88_v12, %v87_v11  ;;  %v263_v16 = vpack.c.bf16 %v90_v15, %v89_v14  ;;  %v91_v17 = vld [vmem:[#allocation7 + $0x50] sm:$0xff]  ;;  %v92_v18 = vld [vmem:[#allocation7 + $0x58] sm:$0xff]  ;;  %v93_v20 = vld [vmem:[#allocation7 + $0x60] sm:$0xff]  ;;  %p373_p4 = scmp.ne.s32.totalorder %s188_s16, %s372_s17  ;;  %p378_p6 = scmp.lt.s32.totalorder %s372_s17, %s372_s17 }
  0x4e   :  { %253 = vmatprep.subr.bf16.mxu0 %v408_v0  ;;  %v266_v19 = vpack.c.bf16 %v92_v18, %v91_v17  ;;  %v94_v21 = vld [vmem:[#allocation7 + $0x68] sm:$0xff]  ;;  %v95_v23 = vld [vmem:[#allocation7 + $0x70] sm:$0xff]  ;;  %v96_v24 = vld [vmem:[#allocation7 + $0x78] sm:$0xff] }
  0x4f   :  { %v269_v22 = vpack.c.bf16 %v94_v21, %v93_v20  ;;  %v272_v25 = vpack.c.bf16 %v96_v24, %v95_v23  ;;  %v75_v26 = vld [vmem:[#allocation2] sm:$0xff]  ;;  %v78_v27 = vld [vmem:[#allocation5] sm:$0xff]  ;;  %v176_v32 = vld [vmem:[#allocation8] sm:$0xff]  ;;  %p379_p7 = por %p378_p6, %p377_p5 }
  0x50   :  { %v79_v28 = vmul.f32 %v78_v27, %v75_v26  ;;  %v174_v30 = vld [vmem:[%s508_s3] sm:$0xff] }
  0x51   :  { %255 = vmatpush3.bf16.msra.mxu0 %v254_v7  ;;  %p380_p8 = pnand %p379_p7, %p373_p4 }
  0x52   :  { %256 = vmatprep.subr.bf16.mxu0 %v408_v0 }
  0x55   :  { %258 = vmatpush3.bf16.msra.mxu0 %v257_v10 }
  0x56   :  { %259 = vmatprep.subr.bf16.mxu0 %v408_v0 }
  0x59   :  { %261 = vmatpush3.bf16.msra.mxu0 %v260_v13 }
  0x5a   :  { %262 = vmatprep.subr.bf16.mxu0 %v408_v0 }
  0x5d   :  { %264 = vmatpush3.bf16.msra.mxu0 %v263_v16 }
  0x5e   :  { %265 = vmatprep.subr.bf16.mxu0 %v408_v0 }
  0x61   :  { %267 = vmatpush3.bf16.msra.mxu0 %v266_v19 }
  0x62   :  { %268 = vmatprep.subr.bf16.mxu0 %v408_v0 }
  0x65   :  { %270 = vmatpush3.bf16.msra.mxu0 %v269_v22 }
  0x66   :  { %271 = vmatprep.subr.bf16.mxu0 %v408_v0 }
  0x69   :  { %273 = vmatpush3.bf16.msra.mxu0 %v272_v25 }
  0x6c   :  { %248 = vmatmul.mubr.f32.vlgmr.msra.gmra.mrb[0].mxu0 %v79_v28 }
 0x13f   :  { %v163_v29 = vpop.f32.mrb[0].mxu0 }
 0x140   :  { %v249_v31 = vpop.f32.mrb[1].mxu0  ;;  %v178_v33 = vmul.f32 %v174_v30, %v163_v29 }
 0x142   :  { %v179_v34 = vadd.f32 %v178_v33, %v176_v32 }
 0x144   :  { %180 = vst [vmem:[#allocation10] sm:$0xff] %v179_v34 }
 0x145   :  { %383 = shalt.err (!%p380_p8)
}
 0x146   :  { %s384_s20 = scalar_lea.hbm %s510_s5, 128 }
 0x147   :  { %p385_p9 = scmp.ne.s32.totalorder %s510_s5, %s384_s20  ;;  %p388_p10 = scmp.lt.u32.totalorder %s384_s20, %s510_s5 }
 0x149   :  { %p390_p11 = pnand %p388_p10, %p385_p9 }
 0x14b   :  { %393 = shalt.err (!%p390_p11)
}
 0x14c   :  { %190 = dma.vmem_to_hbm [thread:$0]  %s188_s16, 128, %s510_s5, [#allocation4]  }
 0x14d   :  { %400 = dma.done.wait [#allocation4], 128  }
 0x14e   :  { %401 = vsyncadd [#allocation4], 4294967168 }
 0x14f   :  { %194 = vsyncpa [#allocation3], 1 }
 0x150   :  { %195 = vsyncpa [#allocation6], 1 }
 0x151   :  { %196 = vsyncpa [#allocation9], 1 }
 0x152   :  { %197 = vsyncpa [#allocation4], 1 }

</bundles_post_ra>
